<compile_context>
chip_gen: v7x
topology: tpu7x:2x2x1
jax: 0.10.0
libtpu: 0.0.40
codegen_flags: <defaults>
</compile_context>

<pallas_src>
import jax
import jax.numpy as jnp
from jax.experimental import pallas as pl
from jax.experimental.pallas import tpu as pltpu

LANE = 128
MAX_TILE_ROWS = 4096  # 4096 x 128 f32 = 2 MiB per block (x2 buffers each for in/out)


def _round_up(n, m):
    return ((n + m - 1) // m) * m


def rational_kernel(coeffs_ref, x_ref, o_ref):
    # coeffs_ref: SMEM f32[8], row-major flatten of the (4,2) coeff matrix:
    #   [a3, b3, a2, b2, a1, b1, a0, b0]   (b3 ignored — forward() zeroes it)
    x = x_ref[...].astype(jnp.float32)
    a3 = coeffs_ref[0]
    a2 = coeffs_ref[2]
    b2 = coeffs_ref[3]
    a1 = coeffs_ref[4]
    b1 = coeffs_ref[5]
    a0 = coeffs_ref[6]
    b0 = coeffs_ref[7]
    # Horner evaluation of P(x) (deg 3) and Q(x) (deg 2).
    p = ((a3 * x + a2) * x + a1) * x + a0
    q = (b2 * x + b1) * x + b0
    # EUP reciprocal + one Newton-Raphson refinement instead of a VALU divide chain.
    r = pl.reciprocal(q, approx=True)
    r = r * (2.0 - q * r)
    o_ref[...] = (p * r).astype(o_ref.dtype)


def _rational_flat_jnp(xf, cflat):
    """Plain-JAX evaluation for tiny / ragged tails (same math as the kernel)."""
    x = xf.astype(jnp.float32)
    p = ((cflat[0] * x + cflat[2]) * x + cflat[4]) * x + cflat[6]
    q = (cflat[3] * x + cflat[5]) * x + cflat[7]
    return (p / q).astype(xf.dtype)


def rational(x, coeffs):
    """Pallas implementation of Rational.forward. x: any shape / float dtype."""
    orig_shape = x.shape
    orig_dtype = x.dtype
    # Coefficients stay f32 in SMEM (32-bit scalars anyway; better numerics for bf16 x).
    cflat = coeffs.reshape(-1).astype(jnp.float32)

    total = x.size
    xf = x.reshape(-1)
    aligned = (total // LANE) * LANE
    rows = aligned // LANE

    if rows == 0:
        # Fewer than 128 elements: not worth a kernel launch.
        return _rational_flat_jnp(xf, cflat).reshape(orig_shape)

    x2 = (xf if aligned == total else xf[:aligned]).reshape(rows, LANE)

    # dtype-aware sublane packing: 8 rows/vreg for 32-bit, 16 for bf16, 32 for int8/fp8.
    sub = 8 * max(1, 4 // jnp.dtype(orig_dtype).itemsize)
    if rows > sub:
        # Guarantee >= 2 grid steps so v7x's second TensorCore gets work.
        tile_rows = min(MAX_TILE_ROWS, _round_up(-(-rows // 2), sub))
    else:
        tile_rows = _round_up(rows, sub)
    grid = (pl.cdiv(rows, tile_rows),)

    out2 = pl.pallas_call(
        rational_kernel,
        out_shape=jax.ShapeDtypeStruct((rows, LANE), orig_dtype),
        grid_spec=pltpu.PrefetchScalarGridSpec(
            num_scalar_prefetch=0,
            grid=grid,
            in_specs=[
                pl.BlockSpec(memory_space=pltpu.MemorySpace.SMEM),   # coeffs f32[8]
                pl.BlockSpec((tile_rows, LANE), lambda i: (i, 0)),   # x tile
            ],
            out_specs=pl.BlockSpec((tile_rows, LANE), lambda i: (i, 0)),
        ),
        compiler_params=pltpu.CompilerParams(
            dimension_semantics=("parallel",),
            vmem_limit_bytes=32 << 20,  # documents the budget; blocks use <= ~8 MiB
        ),
    )(cflat, x2)

    out_flat = out2.reshape(-1)
    if aligned != total:
        # Tiny (<128 elem) ragged tail computed in plain JAX — no full-array pad copy.
        tail = _rational_flat_jnp(xf[aligned:], cflat)
        out_flat = jnp.concatenate([out_flat, tail])
    return out_flat.reshape(orig_shape)


def rational_reference(x, coeffs):
    """Pure-JAX reference mirroring the PyTorch forward exactly."""
    coeffs = coeffs.at[0, 1].set(0.0)
    exp = jnp.array([3.0, 2.0, 1.0, 0.0], dtype=x.dtype)
    X = jnp.power(x[..., None], exp)
    PQ = X @ coeffs.astype(x.dtype)
    return PQ[..., 0] / PQ[..., 1]


if __name__ == "__main__":
    # Deterministic init of the (4, 2) coefficient parameter (reset_parameters).
    coeffs = jnp.array(
        [[1.1915, 0.0],
         [1.5957, 2.383],
         [0.5, 0.0],
         [0.0218, 1.0]], dtype=jnp.float32)

    key = jax.random.PRNGKey(0)
    x = jax.random.normal(key, (2, 4, 16, 16), dtype=jnp.float32)  # NCHW

    out = rational(x, coeffs)
    out = jax.block_until_ready(out)

    ref = rational_reference(x, coeffs)
    assert out.shape == x.shape and out.dtype == x.dtype
    assert jnp.allclose(out, ref, rtol=1e-5, atol=1e-5)

    print("KERNEL_OK")
</pallas_src>

<mosaic_0001>
module attributes {stable_mosaic.version = 11 : i64} {
  func.func @rational_kernel(%arg0: i32, %arg1: memref<8xf32, #tpu.memory_space<smem>>, %arg2: memref<8x128xf32, #tpu.memory_space<vmem>>, %arg3: memref<8x128xf32, #tpu.memory_space<vmem>>) attributes {dimension_semantics = [#tpu.dimension_semantics<parallel>], iteration_bounds = array<i64: 2>, scalar_prefetch = 0 : i64, scratch_operands = 0 : i64, tpu.core_type = #tpu.core_type<tc>, window_params = [{transform_indices = @transform_0, window_bounds = array<i64: 8>}, {transform_indices = @transform_1, window_bounds = array<i64: 8, 128>}, {transform_indices = @transform_2, window_bounds = array<i64: 8, 128>}]} {
    %c0 = arith.constant 0 : index
    %c0_0 = arith.constant 0 : index
    %0 = vector.load %arg2[%c0, %c0_0] : memref<8x128xf32, #tpu.memory_space<vmem>>, vector<8x128xf32>
    %c0_1 = arith.constant 0 : index
    %1 = memref.load %arg1[%c0_1] : memref<8xf32, #tpu.memory_space<smem>>
    %c2 = arith.constant 2 : index
    %2 = memref.load %arg1[%c2] : memref<8xf32, #tpu.memory_space<smem>>
    %c3 = arith.constant 3 : index
    %3 = memref.load %arg1[%c3] : memref<8xf32, #tpu.memory_space<smem>>
    %c4 = arith.constant 4 : index
    %4 = memref.load %arg1[%c4] : memref<8xf32, #tpu.memory_space<smem>>
    %c5 = arith.constant 5 : index
    %5 = memref.load %arg1[%c5] : memref<8xf32, #tpu.memory_space<smem>>
    %c6 = arith.constant 6 : index
    %6 = memref.load %arg1[%c6] : memref<8xf32, #tpu.memory_space<smem>>
    %c7 = arith.constant 7 : index
    %7 = memref.load %arg1[%c7] : memref<8xf32, #tpu.memory_space<smem>>
    %8 = vector.broadcast %1 : f32 to vector<8x128xf32>
    %9 = arith.mulf %8, %0 : vector<8x128xf32>
    %10 = vector.broadcast %2 : f32 to vector<8x128xf32>
    %11 = arith.addf %9, %10 : vector<8x128xf32>
    %12 = arith.mulf %11, %0 : vector<8x128xf32>
    %13 = vector.broadcast %4 : f32 to vector<8x128xf32>
    %14 = arith.addf %12, %13 : vector<8x128xf32>
    %15 = arith.mulf %14, %0 : vector<8x128xf32>
    %16 = vector.broadcast %6 : f32 to vector<8x128xf32>
    %17 = arith.addf %15, %16 : vector<8x128xf32>
    %18 = vector.broadcast %3 : f32 to vector<8x128xf32>
    %19 = arith.mulf %18, %0 : vector<8x128xf32>
    %20 = vector.broadcast %5 : f32 to vector<8x128xf32>
    %21 = arith.addf %19, %20 : vector<8x128xf32>
    %22 = arith.mulf %21, %0 : vector<8x128xf32>
    %23 = vector.broadcast %7 : f32 to vector<8x128xf32>
    %24 = arith.addf %22, %23 : vector<8x128xf32>
    %25 = tpu.reciprocal %24 {approx = true} : vector<8x128xf32> -> vector<8x128xf32>
    %26 = arith.mulf %24, %25 : vector<8x128xf32>
    %cst = arith.constant 2.000000e+00 : f32
    %27 = vector.broadcast %cst : f32 to vector<8x128xf32>
    %28 = arith.subf %27, %26 : vector<8x128xf32>
    %29 = arith.mulf %25, %28 : vector<8x128xf32>
    %30 = arith.mulf %17, %29 : vector<8x128xf32>
    %c0_2 = arith.constant 0 : index
    %c0_3 = arith.constant 0 : index
    %31 = vector.load %arg3[%c0_2, %c0_3] : memref<8x128xf32, #tpu.memory_space<vmem>>, vector<8x128xf32>
    tpu.vector_store %arg3[%c0_2, %c0_3], %30 {strides = array<i32>} : memref<8x128xf32, #tpu.memory_space<vmem>>, vector<8x128xf32>,
    return
  }
  func.func @transform_0(%arg0: i32) -> i32 {
    %c0_i32 = arith.constant 0 : i32
    %c0_i32_0 = arith.constant 0 : i32
    return %c0_i32 : i32
  }
  func.func @transform_1(%arg0: i32) -> (i32, i32) {
    %c0_i32 = arith.constant 0 : i32
    %c0_i32_0 = arith.constant 0 : i32
    return %arg0, %c0_i32 : i32, i32
  }
  func.func @transform_2(%arg0: i32) -> (i32, i32) {
    %c0_i32 = arith.constant 0 : i32
    %c0_i32_0 = arith.constant 0 : i32
    return %arg0, %c0_i32 : i32, i32
  }
}

</mosaic_0001>

<bundles_post_ra>
// kernel: tpu_custom_call.1
= control target key start
LH: loop header
LB: loop body
LE: loop exit
PB: predicated region body
PF: predicated region fallthrough
CT: control target
= control target key end

     0   :  { %7 = vsyncpa [#allocation5], 0  ;;  %s719_s0 = inlined_call_operand.hbm [shape: f32[8], index: 0, kind: input, shape index: {}]   ;;  %s720_s1 = inlined_call_operand.hbm [shape: f32[16,128], index: 1, kind: input, shape index: {}]   ;;  %s721_s2 = inlined_call_operand.hbm [shape: f32[16,128], index: 2, kind: output, shape index: {}]  }
   0x1   :  { %8 = vsyncpa [#allocation3], 0 }
   0x2   :  { %10 = vsyncpa [#allocation3 + $0x1], 0 }
   0x3   :  { %11 = vsyncpa [#allocation4], 0 }
   0x4   :  { %13 = vsyncpa [#allocation4 + $0x1], 0  ;;  %s510_s9 = smov 0   ;;  %s512_s10 = smov 0  }
   0x5   :  { %s514_s11 = smov 0   ;;  %s516_s12 = smov 0  }
   0x6 LB: > { %s531_s13 = sadd.s32 4294967295, %s490_s12   ;;  %s298_s14 = sadd.s32 4294967294, %s490_s12   ;;  %s490_s12 = sphi %s516_s12, %s742_s12   ;;  %s486_s11 = sphi %s514_s11, %s741_s11   ;;  %s482_s10 = sphi %s512_s10, %s740_s10   ;;  %s478_s9 = sphi %s510_s9, %s739_s9  }
   0x7   : > { %p60_p0 = scmp.ne.s32.totalorder %s482_s10, %s478_s9  ;;  %p722_p1 = scmp.eq.s32.totalorder %s531_s13, 0 }
   0x8   : > { %p90_p3 = scmp.eq.s32.totalorder %s298_s14, 1  ;;  %p299_p5 = scmp.ge.s32.totalorder %s490_s12, 1 }
   0x9   : > { %p540_p4 = por %p722_p1, %p60_p0  ;;  %p97_p7 = scmp.lt.s32.totalorder %s490_s12, 3 }
   0xa   : > { %p545_p6 = por %p90_p3, %p60_p0  ;;  %s556_s18 = sadd.s32 1, %s490_s12  }
   0xb   : > { %s725_s15 = scalar_select %p540_p4, 1, 0 }
   0xc   : > { %s726_s16 = scalar_select %p545_p6, 1, 0 }
   0xd   : > { %p550_p8 = pnand %p299_p5, %p97_p7  ;;  %s44_s19 = ssub.s32 %s490_s12, %s556_s18 }
   0xe   : > { %s47_s20 = sadd.s32 1, %s486_s11  ;;  %p569_p12 = scmp.eq.s32.totalorder %s44_s19, 0 }
   0xf   : > { %p326_p10 = pneg %p550_p8  ;;  %p54_p13 = scmp.ne.s32.totalorder %s486_s11, %s482_s10 }
  0x10   : > { %p55_p0 = scmp.eq.s32.totalorder %s490_s12, 0  ;;  %p339_p3 = scmp.lt.s32.totalorder %s490_s12, 2 }
  0x11   : > { %p565_p11 = pnand %p326_p10, %p722_p1  ;;  %s377_s25 = scalar_lea.hbm %s719_s0, 16 }
  0x12   : > { %p378_p5 = scmp.ne.s32.totalorder %s719_s0, %s377_s25  ;;  %p384_p1 = scmp.lt.u32.totalorder %s377_s25, %s719_s0 }
  0x13   : > { %p379_p7 = pneg %p565_p11 }
  0x15   : > { %p380_p10 = pnand %p379_p7, %p378_p5 }
  0x17   : > { %p381_p9 = pneg %p380_p10 }
  0x19   : > { %p386_p2 = pnand %p384_p1, %p381_p9 }
  0x1b   : > { %389 = shalt.err (!%p386_p2)
}
  0x1c   : > { %s492_s30 = smov [#allocation2]   ;;  %p56_p1 = por %p55_p0, %p54_p13 }
  0x1d   : > { %329 = dma.hbm_to_smem (!%p565_p11), %s719_s0, 16, %s492_s30, [#allocation5]  }
  0x1e   : > { %s596_s5 = scalar_select %p569_p12, %s486_s11, %s47_s20  }
  0x1f   : > { %p730_p2 = scmp.eq.s32.totalorder %s531_s13, 1  ;;  %s119_s7 = sand.u32 1, %s486_s11  }
  0x20   : > { %s303_s8 = sshll.u32 %s490_s12, 7  ;;  %s302_s14 = sshll.u32 %s119_s7, 3 }
  0x21   : > { %p608_p9 = por %p730_p2, %p54_p13  ;;  %s617_s23 = scalar_lea.hbm %s720_s1, %s303_s8 }
  0x22   : > { %s123_s20 = scalar_lea.vmem [#allocation6], %s302_s14  ;;  %p621_p11 = pnand %p339_p3, %p56_p1 }
  0x23   : > { %s731_s6 = scalar_select %p608_p9, 1, 0 }
  0x24   : > { %s130_s22 = sshll.u32 %s123_s20, 4  ;;  %s120_s25 = scalar_lea.sflag [#allocation3], %s119_s7  ;;  %s625_s22 = int_to_ptr.vmem [resolvable:$true] %s130_s22 }
  0x25   : > { %s390_s26 = scalar_lea.hbm %s617_s23, 128  ;;  %p392_p13 = pneg %p621_p11 }
  0x26   : > { %p391_p12 = scmp.ne.s32.totalorder %s617_s23, %s390_s26  ;;  %s395_s29 = scalar_lea.hbm %s720_s1, 256 }
  0x27   : > { %p396_p3 = scmp.lt.u32.totalorder %s617_s23, %s720_s1  ;;  %p397_p7 = scmp.lt.u32.totalorder %s395_s29, %s390_s26 }
  0x28   : > { %p393_p0 = pnand %p392_p13, %p391_p12  ;;  %p399_p1 = scmp.lt.u32.totalorder %s390_s26, %s617_s23 }
  0x29   : > { %p398_p10 = por %p397_p7, %p396_p3 }
  0x2a   : > { %p394_p5 = pneg %p393_p0 }
  0x2b   : > { %p400_p2 = por %p399_p1, %p398_p10 }
  0x2d   : > { %p401_p6 = pnand %p400_p2, %p394_p5 }
  0x2f   : > { %404 = shalt.err (!%p401_p6)
}
  0x30   : > { %s405_s4 = scalar_lea.vmem %s625_s22, 128  ;;  %s493_s7 = smov [#allocation6]  }
  0x31   : > { %p406_p12 = scmp.ne.s32.totalorder %s625_s22, %s405_s4  ;;  %s410_s8 = sshll.u32 %s493_s7, 4  ;;  %s411_s8 = int_to_ptr.vmem [resolvable:$false] %s410_s8 }
  0x32   : > { %s412_s14 = scalar_lea.vmem %s411_s8, 256  ;;  %p413_p4 = scmp.lt.s32.totalorder %s625_s22, %s411_s8 }
  0x33   : > { %p408_p0 = pnand %p406_p12, %p392_p13  ;;  %p414_p3 = scmp.lt.s32.totalorder %s412_s14, %s405_s4 }
  0x35   : > { %p409_p9 = pneg %p408_p0  ;;  %p415_p7 = por %p414_p3, %p413_p4 }
  0x37   : > { %p416_p10 = pnand %p415_p7, %p409_p9 }
  0x39   : > { %419 = shalt.err (!%p416_p10)
}
  0x3a   : > { %333 = dma.hbm_to_vmem [thread:$0]  (!%p621_p11), %s617_s23, 128, %s625_s22, %s120_s25  }
  0x3b   : > { %139 = sbr.rel (%p550_p8) target bundleno = 121 (0x79), region = 28  ;;  %p733_p6 = scmp.eq.s32.totalorder (!%p550_p8), %s531_s13, 0 }
  0x42   : > { %465 = dma.done.wait (%p733_p6), [#allocation5], 16   ;;  %p734_p13 = pmov %p733_p6 }
  0x43   : > { %s659_s19 = sand.u32 1, %s482_s10   ;;  %p735_p4 = scmp.ne.s32.totalorder %s725_s15, 0 }
  0x44   : > { %467 = vsyncadd (%p734_p13), [#allocation5], 4294967280  ;;  %s306_s21 = sshll.u32 %s659_s19, 3  ;;  %s146_s20 = scalar_lea.sflag [#allocation3], %s659_s19 }
  0x45   : > { %s149_s23 = scalar_lea.vmem [#allocation6], %s306_s21 }
  0x46   : > { %469 = dma.done.wait (%p735_p4), %s146_s20, 128  }
  0x47   : > { %471 = vsyncadd (%p735_p4), %s146_s20, 4294967168 }
  0x48   : > { %154 = sfence }
  0x49   : > { %s172_s17 = sld [smem:[#allocation2]]  ;;  %s309_s22 = sld [smem:[#allocation2 + $0x3]]  ;;  %v171_v0 = vld [vmem:[%s149_s23] sm:$0xff] }
  0x4a   : > { %s308_s24 = sld [smem:[#allocation2 + $0x2]]  ;;  %s311_s25 = sld [smem:[#allocation2 + $0x5]] }
  0x4b   : > { %s313_s26 = sld [smem:[#allocation2 + $0x7]]  ;;  %s310_s27 = sld [smem:[#allocation2 + $0x4]] }
  0x4c   : > { %s312_s15 = sld [smem:[#allocation2 + $0x6]]  ;;  %s170_s28 = scalar_lea.vmem [#allocation7], %s306_s21 }
  0x4d   : > { %s216_s29 = sshll.u32 %s170_s28, 4  ;;  %s315_s30 = sshll.u32 %s531_s13, 7  ;;  %s672_s29 = int_to_ptr.vmem [resolvable:$true] %s216_s29 }
  0x4e   : > { %s677_s7 = scalar_lea.hbm %s721_s2, %s315_s30  ;;  %s203_s8 = scalar_lea.sflag [#allocation4], %s659_s19 }
  0x4f   : > { %v179_v1 = vstv %s172_s17  ;;  %v189_v2 = vstv %s309_s22  ;;  %s420_s14 = scalar_lea.vmem %s672_s29, 128  ;;  %p736_p9 = scmp.ne.s32.totalorder %s731_s6, 0 }
  0x50   : > { %v190_v3 = vmul.f32 %v189_v2, %v171_v0  ;;  %v191_v4 = vstv %s311_s25  ;;  %v180_v5 = vmul.f32 %v179_v1, %v171_v0  ;;  %v181_v6 = vstv %s308_s24  ;;  %p421_p8 = scmp.ne.s32.totalorder %s672_s29, %s420_s14  ;;  %s494_s13 = smov [#allocation7]  }
  0x51   : > { %v194_v8 = vstv %s313_s26  ;;  %v184_v13 = vstv %s310_s27  ;;  %s424_s21 = sshll.u32 %s494_s13, 4  ;;  %s425_s21 = int_to_ptr.vmem [resolvable:$false] %s424_s21 }
  0x52   : > { %v192_v7 = vadd.f32 %v191_v4, %v190_v3  ;;  %v182_v10 = vadd.f32 %v181_v6, %v180_v5  ;;  %v187_v17 = vstv %s312_s15  ;;  %p422_p11 = pnand %p421_p8, %p736_p9  ;;  %s426_s20 = scalar_lea.vmem %s425_s21, 256 }
  0x53   : > { %p427_p1 = scmp.lt.s32.totalorder %s672_s29, %s425_s21  ;;  %p428_p2 = scmp.lt.s32.totalorder %s426_s20, %s420_s14 }
  0x54   : > { %v193_v9 = vmul.f32 %v192_v7, %v171_v0  ;;  %v183_v12 = vmul.f32 %v182_v10, %v171_v0  ;;  %p423_p5 = pneg %p422_p11 }
  0x55   : > { %p429_p12 = por %p428_p2, %p427_p1 }
  0x56   : > { %v195_v11 = vadd.f32 %v194_v8, %v193_v9  ;;  %v185_v14 = vadd.f32 %v184_v13, %v183_v12 }
  0x57   : > { %p430_p0 = pnand %p429_p12, %p423_p5 }
  0x58   : > { %375 = vrcp.f32 %v195_v11  ;;  %v186_v15 = vmul.f32 %v185_v14, %v171_v0 }
  0x5a   : > { %v188_v19 = vadd.f32 %v187_v17, %v186_v15 }
  0x62   : > { %v376_v16 = vpop.eup %375 }
  0x63   : > { %v197_v18 = vmul.f32 %v376_v16, %v195_v11 }
  0x65   : > { %v198_v20 = vsub.f32 2.0, %v197_v18 }
  0x67   : > { %v199_v21 = vmul.f32 %v376_v16, %v198_v20 }
  0x69   : > { %v200_v22 = vmul.f32 %v199_v21, %v188_v19 }
  0x6b   : > { %201 = vst [vmem:[%s170_s28] sm:$0xff] %v200_v22 }
  0x6c   : > { %433 = shalt.err (!%p430_p0)
}
  0x6d   : > { %s434_s19 = scalar_lea.hbm %s677_s7, 128  ;;  %s438_s22 = scalar_lea.hbm %s721_s2, 256 }
  0x6e   : > { %p435_p3 = scmp.ne.s32.totalorder %s677_s7, %s434_s19  ;;  %p439_p6 = scmp.lt.u32.totalorder %s677_s7, %s721_s2 }
  0x6f   : > { %p440_p13 = scmp.lt.u32.totalorder %s438_s22, %s434_s19  ;;  %p442_p8 = scmp.lt.u32.totalorder %s434_s19, %s677_s7 }
  0x70   : > { %p436_p7 = pnand %p435_p3, %p736_p9 }
  0x71   : > { %p441_p4 = por %p440_p13, %p439_p6 }
  0x72   : > { %p437_p10 = pneg %p436_p7 }
  0x73   : > { %p443_p11 = por %p442_p8, %p441_p4 }
  0x75   : > { %p444_p5 = pnand %p443_p11, %p437_p10 }
  0x77   : > { %447 = shalt.err (!%p444_p5)
}
  0x78   : > { %324 = dma.vmem_to_hbm [thread:$0]  (%p736_p9), %s672_s29, 128, %s677_s7, %s203_s8  }
  0x79 PF: > { %s228_s26 = sand.u32 1, %s478_s9   ;;  %p737_p1 = scmp.ne.s32.totalorder %s726_s16, 0 }
  0x7a   : > { %p738_p2 = scmp.ge.s32.totalorder %s490_s12, 2  ;;  %s229_s27 = scalar_lea.sflag [#allocation4], %s228_s26 }
  0x7c   : > { %p335_p12 = pnand %p738_p2, %p737_p1 }
  0x7e   : > { %473 = dma.done.wait (!%p335_p12), %s229_s27, 128  }
  0x7f   : > { %475 = vsyncadd (!%p335_p12), %s229_s27, 4294967168  ;;  %p16_p0 = scmp.ge.s32.totalorder %s556_s18, 4   ;;  %s739_s9 = smov %s482_s10 }
  0x80   : > { %s740_s10 = smov %s486_s11  ;;  %s741_s11 = smov %s596_s5 }
  0x81   : > { %s742_s12 = smov %s556_s18  ;;  %18 = sbr.rel (!%p16_p0) target bundleno = 6 (0x6), region = 78 }
  0x88   :  { %234 = vsyncpa [#allocation3], 1 }
  0x89   :  { %236 = vsyncpa [#allocation3 + $0x1], 1 }
  0x8a   :  { %237 = vsyncpa [#allocation4], 1 }
  0x8b   :  { %239 = vsyncpa [#allocation4 + $0x1], 1 }
  0x8c   :  { %240 = vsyncpa [#allocation5], 1 }
  0x8d   :  { %242 = vsyncpa [#allocation5 + $0x1], 1 }

</bundles_post_ra>
